<compile_context>
chip_gen: v7x
topology: tpu7x:2x2x1
jax: 0.10.0
libtpu: 0.0.40
codegen_flags: <defaults>
</compile_context>

<pallas_src>
import jax
import jax.numpy as jnp
from jax.experimental import pallas as pl
from jax.experimental.pallas import tpu as pltpu


def _log1p_kernel(scale_ref, x_ref, o_ref):
    # scale_ref: (tR, 1) f32, resident across the T grid axis; x/o: (tR, tT).
    x = x_ref[...].astype(jnp.float32)
    o_ref[...] = jnp.log1p(scale_ref[...] * x).astype(o_ref.dtype)


def _round_up(v, m):
    return ((v + m - 1) // m) * m


def _target_block_bytes():
    # ~4 MiB tiles on v6e/v7x (fits 4 double-buffers in 32 MiB scoped VMEM);
    # ~2 MiB on v5e/older (16 MiB scoped VMEM).
    try:
        kind = jax.devices()[0].device_kind.lower()
    except Exception:
        kind = ""
    if "v6" in kind or "v7" in kind:
        return 4 * 1024 * 1024
    return 2 * 1024 * 1024


def log1p_pallas(x, a, per_band=True):
    """Applies log(1 + 10**a * x).

    x: (B, num_bands, T)
    a: scalar or (num_bands,)
    """
    B, num_bands, T = x.shape
    R = B * num_bands

    # Hoist the parameter transform out of the kernel: scale = 10**a in f32
    # (10**a can overflow fp16/bf16 for moderate a), broadcast over time in-kernel.
    a = jnp.asarray(a, dtype=jnp.float32)
    if a.ndim == 0:
        a = jnp.broadcast_to(a, (num_bands,))
    scale = jnp.power(jnp.float32(10.0), a)            # (num_bands,) f32
    scale = jnp.tile(scale, (B,)).reshape(R, 1)        # (R, 1) f32, row i -> band i % nb

    # Fold batch into the sublane axis (free, contiguous reshape).
    x2 = x.reshape(R, T)

    elem = jnp.dtype(x.dtype).itemsize
    target = _target_block_bytes()

    # Row (sublane) tile: full R when small (block == full dim is always legal),
    # otherwise a multiple of 8; the ragged last row-block is masked by Pallas.
    tR = R if R <= 512 else 512

    # Time (lane) tile: multiple of 128, sized so one block stays <= target bytes.
    # No padding of T: the ragged final T tile is a masked store only.
    tT_cap = max(128, (target // max(tR, 1) // elem) // 128 * 128)
    tT = min(tT_cap, _round_up(T, 128))

    # Keep enough grid steps so both TensorCores get work on v7x.
    def _steps(tt):
        return pl.cdiv(R, tR) * pl.cdiv(T, tt)

    while tT > 128 and _steps(tT) < 8:
        tT = max(128, (tT // 2) // 128 * 128)

    grid = (pl.cdiv(R, tR), pl.cdiv(T, tT))

    out = pl.pallas_call(
        _log1p_kernel,
        out_shape=jax.ShapeDtypeStruct((R, T), x.dtype),
        grid_spec=pltpu.PrefetchScalarGridSpec(
            num_scalar_prefetch=0,
            grid=grid,
            in_specs=[
                # Tiny scale block; constant column index keeps it resident
                # across the T axis (no re-DMA per time tile).
                pl.BlockSpec((tR, 1), lambda r, t: (r, 0)),
                pl.BlockSpec((tR, tT), lambda r, t: (r, t)),
            ],
            out_specs=pl.BlockSpec((tR, tT), lambda r, t: (r, t)),
        ),
        compiler_params=pltpu.CompilerParams(
            dimension_semantics=("parallel", "parallel")),
    )(scale, x2)

    return out.reshape(B, num_bands, T)


def log1p_ref(x, a, per_band=True):
    a = jnp.asarray(a, dtype=jnp.float32)
    if per_band:
        if a.ndim == 0:
            a = jnp.broadcast_to(a, (x.shape[1],))
        a = a[:, None]
    return jnp.log1p((10.0 ** a) * x)


if __name__ == "__main__":
    key = jax.random.PRNGKey(0)
    B, num_bands, T = 2, 16, 200  # T not a multiple of 128 -> exercises ragged last tile

    # Deterministic parameter init (module __init__: a = full((num_bands,), a0))
    a0 = 0.3
    a = jnp.full((num_bands,), a0, dtype=jnp.float32)

    # Non-negative inputs (typical spectrogram-like magnitudes)
    x = jnp.abs(jax.random.normal(key, (B, num_bands, T), dtype=jnp.float32))

    y = log1p_pallas(x, a, per_band=True)
    y = jax.block_until_ready(y)

    y_ref = log1p_ref(x, a, per_band=True)
    assert y.shape == y_ref.shape, "shape mismatch vs reference"
    assert jnp.allclose(y, y_ref, atol=1e-5, rtol=1e-5), "mismatch vs reference"

    # Scalar / non-per-band case (a == 0 path in the module -> scale == 1, same kernel).
    y2 = jax.block_until_ready(log1p_pallas(x, jnp.float32(0.0), per_band=False))
    assert jnp.allclose(y2, jnp.log1p(x), atol=1e-5, rtol=1e-5), "scalar-a mismatch"

    print("KERNEL_OK")
</pallas_src>

<mosaic_0001>
module attributes {stable_mosaic.version = 11 : i64} {
  func.func @_log1p_kernel(%arg0: i32, %arg1: i32, %arg2: memref<32x1xf32, #tpu.memory_space<vmem>>, %arg3: memref<32x128xf32, #tpu.memory_space<vmem>>, %arg4: memref<32x128xf32, #tpu.memory_space<vmem>>) attributes {dimension_semantics = [#tpu.dimension_semantics<parallel>, #tpu.dimension_semantics<parallel>], iteration_bounds = array<i64: 1, 2>, scalar_prefetch = 0 : i64, scratch_operands = 0 : i64, tpu.core_type = #tpu.core_type<tc>, window_params = [{transform_indices = @transform_0, window_bounds = array<i64: 32, 1>}, {transform_indices = @transform_1, window_bounds = array<i64: 32, 128>}, {transform_indices = @transform_2, window_bounds = array<i64: 32, 128>}]} {
    %c0 = arith.constant 0 : index
    %c0_0 = arith.constant 0 : index
    %0 = vector.load %arg3[%c0, %c0_0] : memref<32x128xf32, #tpu.memory_space<vmem>>, vector<32x128xf32>
    %c0_1 = arith.constant 0 : index
    %c0_2 = arith.constant 0 : index
    %1 = vector.load %arg2[%c0_1, %c0_2] : memref<32x1xf32, #tpu.memory_space<vmem>>, vector<32x1xf32>
    %2 = vector.broadcast %1 : vector<32x1xf32> to vector<32x128xf32>
    %3 = arith.mulf %2, %0 : vector<32x128xf32>
    %4 = math.log1p %3 : vector<32x128xf32>
    %c0_3 = arith.constant 0 : index
    %c0_4 = arith.constant 0 : index
    %5 = vector.load %arg4[%c0_3, %c0_4] : memref<32x128xf32, #tpu.memory_space<vmem>>, vector<32x128xf32>
    tpu.vector_store %arg4[%c0_3, %c0_4], %4 {strides = array<i32>} : memref<32x128xf32, #tpu.memory_space<vmem>>, vector<32x128xf32>,
    return
  }
  func.func @transform_0(%arg0: i32, %arg1: i32) -> (i32, i32) {
    %c0_i32 = arith.constant 0 : i32
    %c0_i32_0 = arith.constant 0 : i32
    return %arg0, %c0_i32 : i32, i32
  }
  func.func @transform_1(%arg0: i32, %arg1: i32) -> (i32, i32) {
    %c0_i32 = arith.constant 0 : i32
    return %arg0, %arg1 : i32, i32
  }
  func.func @transform_2(%arg0: i32, %arg1: i32) -> (i32, i32) {
    %c0_i32 = arith.constant 0 : i32
    return %arg0, %arg1 : i32, i32
  }
}

</mosaic_0001>

<bundles_post_ra>
// kernel: tpu_custom_call.1
= control target key start
LH: loop header
LB: loop body
LE: loop exit
PB: predicated region body
PF: predicated region fallthrough
CT: control target
= control target key end

     0   :  { %7 = vsyncpa [#allocation3], 0  ;;  %s812_s0 = inlined_call_operand.vmem [shape: f32[32,1], index: 0, kind: input, shape index: {}]   ;;  %s813_s1 = inlined_call_operand.hbm [shape: f32[32,200], index: 1, kind: input, shape index: {}]   ;;  %s814_s2 = inlined_call_operand.hbm [shape: f32[32,200], index: 2, kind: output, shape index: {}]  }
   0x1   :  { %9 = vsyncpa [#allocation3 + $0x1], 0 }
   0x2   :  { %10 = vsyncpa [#allocation4], 0 }
   0x3   :  { %12 = vsyncpa [#allocation4 + $0x1], 0  ;;  %s623_s9 = smov 0   ;;  %s625_s10 = smov 0  }
   0x4   :  { %s627_s11 = smov 0   ;;  %s629_s12 = smov 0  }
   0x5   :  { %s631_s13 = smov 0   ;;  %s633_s14 = smov 0  }
   0x6 LB: > { %s392_s15 = sadd.s32 4294967295, %s597_s14   ;;  %s393_s16 = sadd.s32 4294967294, %s597_s14   ;;  %s597_s14 = sphi %s633_s14, %s18_s14   ;;  %s593_s13 = sphi %s631_s13, %s828_s13   ;;  %s589_s12 = sphi %s629_s12, %s827_s12   ;;  %s585_s11 = sphi %s627_s11, %s826_s11   ;;  %s581_s10 = sphi %s625_s10, %s825_s10   ;;  %s577_s9 = sphi %s623_s9, %s824_s9  }
   0x7   : > { %s27_s17 = sadd.s32 1, %s593_s13  ;;  %s65_s18 = sadd.s32 1, %s585_s11 }
   0x8   : > { %p28_p0 = scmp.ge.s32.totalorder %s27_s17, 2  ;;  %p72_p1 = scmp.ne.s32.totalorder %s585_s11, %s581_s10 }
   0x9   : > { %p73_p2 = scmp.eq.s32.totalorder %s597_s14, 0  ;;  %p78_p3 = scmp.ne.s32.totalorder %s581_s10, %s577_s9 }
   0xa   : > { %s830_s17 = smov (%p28_p0, %s27_s17), 0  ;;  %p79_p5 = scmp.eq.s32.totalorder %s392_s15, 0 }
   0xb   : > { %p664_p4 = por %p73_p2, %p72_p1  ;;  %s61_s20 = ssub.s32 %s593_s13, %s830_s17 }
   0xc   : > { %p104_p6 = scmp.eq.s32.totalorder %s392_s15, 1  ;;  %p63_p7 = scmp.eq.s32.totalorder %s61_s20, 0 }
   0xd   : > { %p670_p8 = por %p79_p5, %p78_p3  ;;  %p110_p10 = scmp.eq.s32.totalorder %s393_s16, 1 }
   0xe   : > { %p674_p9 = por %p104_p6, %p72_p1  ;;  %p418_p13 = scmp.lt.s32.totalorder %s597_s14, 2 }
   0xf   : > { %s679_s23 = scalar_select %p63_p7, %s585_s11, %s65_s18  }
  0x10   : > { %s818_s22 = scalar_select %p674_p9, 1, 0 }
  0x11   : > { %p681_p11 = por %p110_p10, %p78_p3  ;;  %s139_s25 = sand.u32 1, %s585_s11  }
  0x12   : > { %s397_s26 = sshll.u32 %s139_s25, 5  ;;  %s398_s27 = sshll.u32 %s593_s13, 7 }
  0x13   : > { %s819_s24 = scalar_select %p681_p11, 1, 0 }
  0x14   : > { %s692_s30 = scalar_lea.hbm %s813_s1, %s398_s27  ;;  %s143_s3 = scalar_lea.vmem [#allocation2], %s397_s26 }
  0x15   : > { %s152_s4 = sshll.u32 %s143_s3, 4  ;;  %p698_p0 = pnand %p418_p13, %p664_p4  ;;  %s694_s4 = int_to_ptr.vmem [resolvable:$true] %s152_s4 }
  0x16   : > { %s702_s6 = scalar_lea.sflag [#allocation3], %s139_s25  ;;  %s485_s7 = scalar_lea.hbm %s692_s30, 512 }
  0x17   : > { %p486_p1 = scmp.ne.s32.totalorder %s692_s30, %s485_s7  ;;  %p487_p2 = pneg %p698_p0 }
  0x18   : > { %s490_s16 = scalar_lea.hbm %s813_s1, 1024  ;;  %p491_p4 = scmp.lt.u32.totalorder %s692_s30, %s813_s1 }
  0x19   : > { %p488_p3 = pnand %p487_p2, %p486_p1  ;;  %p492_p6 = scmp.lt.u32.totalorder %s490_s16, %s485_s7 }
  0x1a   : > { %p494_p10 = scmp.lt.u32.totalorder %s485_s7, %s692_s30 }
  0x1b   : > { %p489_p5 = pneg %p488_p3  ;;  %p493_p7 = por %p492_p6, %p491_p4 }
  0x1d   : > { %p495_p13 = por %p494_p10, %p493_p7 }
  0x1f   : > { %p496_p12 = pnand %p495_p13, %p489_p5 }
  0x21   : > { %499 = shalt.err (!%p496_p12)
}
  0x22   : > { %s500_s20 = scalar_lea.vmem %s694_s4, 512  ;;  %s599_s25 = smov [#allocation2]  }
  0x23   : > { %p501_p1 = scmp.ne.s32.totalorder %s694_s4, %s500_s20  ;;  %s505_s26 = sshll.u32 %s599_s25, 4  ;;  %s506_s26 = int_to_ptr.vmem [resolvable:$false] %s505_s26 }
  0x24   : > { %s507_s27 = scalar_lea.vmem %s506_s26, 1024  ;;  %p508_p9 = scmp.lt.s32.totalorder %s694_s4, %s506_s26 }
  0x25   : > { %p503_p3 = pnand %p501_p1, %p487_p2  ;;  %p509_p4 = scmp.lt.s32.totalorder %s507_s27, %s500_s20 }
  0x27   : > { %p504_p11 = pneg %p503_p3  ;;  %p510_p6 = por %p509_p4, %p508_p9 }
  0x29   : > { %p511_p7 = pnand %p510_p6, %p504_p11 }
  0x2b   : > { %514 = shalt.err (!%p511_p7)
}
  0x2c   : > { %s600_s28 = smov 256   ;;  %s601_s29 = smov 128  }
  0x2d   : > { %s602_s3 = smov 8   ;;  %p399_p12 = scmp.ge.s32.totalorder %s597_s14, 1 }
  0x2e   : > { %413 = dma.hbm_to_vmem [thread:$0]  (!%p698_p0), %s692_s30, 512, %s694_s4, %s702_s6, %s600_s28, %s601_s29, %s602_s3  }
  0x2f   : > { %p160_p2 = scmp.lt.s32.totalorder %s597_s14, 3 }
  0x31   : > { %p161_p5 = pnand %p399_p12, %p160_p2 }
  0x32   : > { %s733_s7 = sand.u32 (!%p161_p5), 1, %s581_s10  }
  0x33   : > { %164 = sbr.rel (%p161_p5) target bundleno = 228 (0xe4), region = 28  ;;  %s400_s8 = sshll.u32 (!%p161_p5), %s733_s7, 5 }
  0x34   : > { %s167_s15 = scalar_lea.sflag (!%p161_p5), [#allocation3], %s733_s7  ;;  %s170_s16 = scalar_lea.vmem (!%p161_p5), [#allocation2], %s400_s8 }
  0x3a   : > { %568 = dma.done.wait (%p670_p8), %s167_s15, 512  }
  0x3b   : > { %570 = vsyncadd (%p670_p8), %s167_s15, 4294966784  ;;  %v603_v0 = vmov 0   ;;  %v210_v1 = vld [vmem:[%s812_s0 + $0x10] sm:$0xff]  ;;  %v208_v2 = vld [vmem:[%s812_s0] sm:$0xff]  ;;  %s195_s25 = scalar_lea.vmem [#allocation5], %s400_s8  ;;  %s403_s27 = sshll.u32 %s589_s12, 7 }
  0x3c   : > { %476 = vset.pattern.permute.xlu1 %v603_v0  ;;  %475 = vset.pattern.permute.xlu0 %v603_v0  ;;  %v211_v3 = vld [vmem:[%s812_s0 + $0x18] sm:$0xff]  ;;  %v209_v4 = vld [vmem:[%s812_s0 + $0x8] sm:$0xff]  ;;  %v206_v5 = vld [vmem:[%s170_s16 + $0x10] sm:$0xff]  ;;  %s292_s26 = sshll.u32 %s195_s25, 4  ;;  %s763_s12 = scalar_lea.hbm %s814_s2, %s403_s27  ;;  %s758_s26 = int_to_ptr.vmem [resolvable:$true] %s292_s26 }
  0x3d   : > { %224 = vperm.xlu1 %476, %v210_v1   ;;  %214 = vperm.xlu0 %475, %v208_v2   ;;  %v204_v6 = vld [vmem:[%s170_s16] sm:$0xff]  ;;  %v207_v11 = vld [vmem:[%s170_s16 + $0x18] sm:$0xff]  ;;  %v205_v14 = vld [vmem:[%s170_s16 + $0x8] sm:$0xff]  ;;  %s277_s3 = scalar_lea.sflag [#allocation4], %s733_s7  ;;  %s515_s8 = scalar_lea.vmem %s758_s26, 512 }
  0x3e   : > { %p516_p8 = scmp.ne.s32.totalorder %s758_s26, %s515_s8  ;;  %p821_p9 = scmp.ne.s32.totalorder %s818_s22, 0 }
  0x3f   : > { %s604_s15 = smov [#allocation5]  }
  0x40   : > { %p517_p11 = pnand %p516_p8, %p821_p9  ;;  %s519_s16 = sshll.u32 %s604_s15, 4  ;;  %s520_s16 = int_to_ptr.vmem [resolvable:$false] %s519_s16 }
  0x41   : > { %229 = vperm.xlu1 %476, %v211_v3   ;;  %219 = vperm.xlu0 %475, %v209_v4   ;;  %s521_s30 = scalar_lea.vmem %s520_s16, 1024  ;;  %p522_p10 = scmp.lt.s32.totalorder %s758_s26, %s520_s16 }
  0x42   : > { %p518_p0 = pneg %p517_p11  ;;  %p523_p13 = scmp.lt.s32.totalorder %s521_s30, %s515_s8 }
  0x44   : > { %p524_p1 = por %p523_p13, %p522_p10 }
  0x46   : > { %p525_p3 = pnand %p524_p1, %p518_p0 }
  0xbc   : > { %v225_v7 = vpop.permute.xlu1 %224  ;;  %v215_v8 = vpop.permute.xlu0 %214 }
  0xbd   : > { %v234_v9 = vmul.f32 %v225_v7, %v206_v5  ;;  %v232_v10 = vmul.f32 %v215_v8, %v204_v6 }
  0xbf   : > { %v254_v12 = vadd.f32 1.0, %v234_v9  ;;  %v236_v13 = vadd.f32 1.0, %v232_v10  ;;  %v257_v20 = vmul.f32 -0.5, %v234_v9  ;;  %v239_v22 = vmul.f32 -0.5, %v232_v10 }
  0xc0   : > { %v230_v15 = vpop.permute.xlu1 %229  ;;  %v220_v16 = vpop.permute.xlu0 %219  ;;  %v260_v24 = vand.u32 2147483647, %v234_v9  ;;  %v242_v28 = vand.u32 2147483647, %v232_v10 }
  0xc1   : > { %477 = vlog2.f32 %v254_v12  ;;  %v235_v17 = vmul.f32 %v230_v15, %v207_v11  ;;  %v233_v18 = vmul.f32 %v220_v16, %v205_v14  ;;  %v258_v23 = vadd.f32 1.0, %v257_v20 }
  0xc2   : > { %479 = vlog2.f32 %v236_v13  ;;  %v240_v26 = vadd.f32 1.0, %v239_v22  ;;  %vm261_vm0 = vcmp.lt.f32.partialorder %v260_v24, 0.0004427343  ;;  %vm243_vm1 = vcmp.lt.f32.partialorder %v242_v28, 0.0004427343 }
  0xc3   : > { %v263_v19 = vadd.f32 1.0, %v235_v17  ;;  %v245_v21 = vadd.f32 1.0, %v233_v18  ;;  %v266_v25 = vmul.f32 -0.5, %v235_v17  ;;  %v248_v27 = vmul.f32 -0.5, %v233_v18 }
  0xc4   : > { %v259_v32 = vmul.f32 %v258_v23, %v234_v9  ;;  %v241_v35 = vmul.f32 %v240_v26, %v232_v10  ;;  %v269_v36 = vand.u32 2147483647, %v235_v17  ;;  %v251_v39 = vand.u32 2147483647, %v233_v18 }
  0xc5   : > { %481 = vlog2.f32 %v263_v19  ;;  %v267_v33 = vadd.f32 1.0, %v266_v25  ;;  %v249_v37 = vadd.f32 1.0, %v248_v27 }
  0xc6   : > { %483 = vlog2.f32 %v245_v21  ;;  %vm270_vm2 = vcmp.lt.f32.partialorder %v269_v36, 0.0004427343  ;;  %vm252_vm3 = vcmp.lt.f32.partialorder %v251_v39, 0.0004427343 }
  0xc7   : > { %v268_v44 = vmul.f32 %v267_v33, %v235_v17  ;;  %v250_v46 = vmul.f32 %v249_v37, %v233_v18 }
  0xcb   : > { %v478_v29 = vpop.eup %477 }
  0xcc   : > { %v480_v30 = vpop.eup %479  ;;  %v256_v31 = vmul.f32 0.6931472, %v478_v29 }
  0xcd   : > { %v238_v34 = vmul.f32 0.6931472, %v480_v30 }
  0xce   : > { %v262_v38 = vsel %vm261_vm0, %v259_v32, %v256_v31 }
  0xcf   : > { %v482_v40 = vpop.eup %481  ;;  %274 = vst [vmem:[%s195_s25 + $0x10] sm:$0xff] %v262_v38  ;;  %v244_v41 = vsel %vm243_vm1, %v241_v35, %v238_v34 }
  0xd0   : > { %v484_v42 = vpop.eup %483  ;;  %272 = vst [vmem:[%s195_s25] sm:$0xff] %v244_v41  ;;  %v265_v43 = vmul.f32 0.6931472, %v482_v40 }
  0xd1   : > { %v247_v45 = vmul.f32 0.6931472, %v484_v42 }
  0xd2   : > { %v271_v47 = vsel %vm270_vm2, %v268_v44, %v265_v43 }
  0xd3   : > { %275 = vst [vmem:[%s195_s25 + $0x18] sm:$0xff] %v271_v47  ;;  %v253_v48 = vsel %vm252_vm3, %v250_v46, %v247_v45 }
  0xd4   : > { %273 = vst [vmem:[%s195_s25 + $0x8] sm:$0xff] %v253_v48 }
  0xd5   : > { %528 = shalt.err (!%p525_p3)
}
  0xd6   : > { %s529_s4 = scalar_lea.hbm %s763_s12, 512  ;;  %s533_s18 = scalar_lea.hbm %s814_s2, 1024 }
  0xd7   : > { %p530_p4 = scmp.ne.s32.totalorder %s763_s12, %s529_s4  ;;  %p534_p12 = scmp.lt.u32.totalorder %s763_s12, %s814_s2 }
  0xd8   : > { %p535_p2 = scmp.lt.u32.totalorder %s533_s18, %s529_s4  ;;  %p537_p8 = scmp.lt.u32.totalorder %s529_s4, %s763_s12 }
  0xd9   : > { %p531_p6 = pnand %p530_p4, %p821_p9 }
  0xda   : > { %p536_p5 = por %p535_p2, %p534_p12 }
  0xdb   : > { %p532_p7 = pneg %p531_p6 }
  0xdc   : > { %p538_p11 = por %p537_p8, %p536_p5 }
  0xde   : > { %p539_p0 = pnand %p538_p11, %p532_p7 }
  0xe0   : > { %542 = shalt.err (!%p539_p0)
}
  0xe1   : > { %s605_s21 = smov 128   ;;  %s606_s25 = smov 256  }
  0xe2   : > { %s607_s27 = smov 8  }
  0xe3   : > { %408 = dma.vmem_to_hbm [thread:$0]  (%p821_p9), %s758_s26, 512, %s763_s12, %s277_s3, %s605_s21, %s606_s25, %s607_s27  }
  0xe4 PF: > { %s307_s28 = sand.u32 1, %s577_s9   ;;  %p822_p10 = scmp.ne.s32.totalorder %s819_s24, 0 }
  0xe5   : > { %p823_p13 = scmp.ge.s32.totalorder %s597_s14, 2  ;;  %s308_s29 = scalar_lea.sflag [#allocation4], %s307_s28 }
  0xe7   : > { %p415_p1 = pnand %p823_p13, %p822_p10 }
  0xe9   : > { %572 = dma.done.wait (!%p415_p1), %s308_s29, 512  }
  0xea   : > { %574 = vsyncadd (!%p415_p1), %s308_s29, 4294966784  ;;  %s18_s14 = sadd.s32 1, %s597_s14   ;;  %s824_s9 = smov %s581_s10 }
  0xeb   : > { %p15_p3 = scmp.ge.s32.totalorder %s18_s14, 4   ;;  %s825_s10 = smov %s585_s11 }
  0xec   : > { %s826_s11 = smov %s679_s23  ;;  %s827_s12 = smov %s593_s13 }
  0xed   : > { %s828_s13 = smov %s830_s17  ;;  %17 = sbr.rel (!%p15_p3) target bundleno = 6 (0x6), region = 76 }
  0xf4   :  { %313 = vsyncpa [#allocation3], 1 }
  0xf5   :  { %315 = vsyncpa [#allocation3 + $0x1], 1 }
  0xf6   :  { %316 = vsyncpa [#allocation4], 1 }
  0xf7   :  { %318 = vsyncpa [#allocation4 + $0x1], 1 }

</bundles_post_ra>
